<compile_context>
chip_gen: v7x
topology: tpu7x:2x2x1
jax: 0.10.0
libtpu: 0.0.40
codegen_flags: <defaults>
</compile_context>

<pallas_src>
import functools

import jax
import jax.numpy as jnp
from jax.experimental import pallas as pl
from jax.experimental.pallas import tpu as pltpu

IN_DIM = 54
K_PAD = 64                # zero-padded contraction dim (aligned DMA rows)
HID_DIM = 128
OUT_DIM = 7
NEG_SLOPE = 0.01          # nn.LeakyReLU default negative_slope
DEFAULT_TILE_B = 8192     # large batch tile: amortizes ~0.35 us/step overhead
TILE_B_ALIGN = 256        # multiple of MXU height (v6e/v7x 256, v5e 128) and 16 sublanes
MAX_VMEM_LIMIT = 48 << 20  # safe on v5e/v6e (128 MiB phys) and v7x (64 MiB phys)


def _round_up(n, m):
    return ((n + m - 1) // m) * m


def _leaky_relu(x):
    return jnp.where(x > 0, x, NEG_SLOPE * x)


def mlp_kernel(x_ref, w1_ref, b1_ref, w2_ref, b2_ref, w3_ref, b3_ref, o_ref):
    # Layer 1: Linear(54->128, padded to 64->128) + LeakyReLU.
    # MXU dot in the storage dtype (f32 or bf16), f32 accumulation.
    h = jnp.dot(x_ref[...], w1_ref[...], preferred_element_type=jnp.float32)
    h = _leaky_relu(h + b1_ref[...].astype(jnp.float32))

    # Layer 2: Linear(128, 128) + LeakyReLU.
    h = jnp.dot(h.astype(w2_ref.dtype), w2_ref[...],
                preferred_element_type=jnp.float32)
    h = _leaky_relu(h + b2_ref[...].astype(jnp.float32))

    # Layer 3: Linear(128, 7) + Tanh.
    h = jnp.dot(h.astype(w3_ref.dtype), w3_ref[...],
                preferred_element_type=jnp.float32)
    o_ref[...] = jnp.tanh(h + b3_ref[...].astype(jnp.float32)).astype(o_ref.dtype)


@functools.partial(jax.jit, static_argnames=("tile_b",))
def quicknn_forward(x, params, *, tile_b=DEFAULT_TILE_B):
    """x: [B, 54] (or [B, 64] pre-padded), f32 or bf16.  Returns [B, 7] float32."""
    w1, b1, w2, b2, w3, b3 = params
    B, K = x.shape
    assert K in (IN_DIM, K_PAD)

    # Pad the contraction dim 54 -> 64 (zero columns in x, zero rows in w1);
    # fuses into the producers, no extra host copy.
    if K == IN_DIM:
        x = jnp.pad(x, ((0, 0), (0, K_PAD - IN_DIM)))
    if w1.shape[0] == IN_DIM:
        w1 = jnp.pad(w1, ((0, K_PAD - IN_DIM), (0, 0)))

    # Big-but-bounded batch tile, rounded to a multiple of 256 (MXU height /
    # bf16 sublane packing); shrinks for small B.
    tile_b = _round_up(min(tile_b, _round_up(B, TILE_B_ALIGN)), TILE_B_ALIGN)
    grid = (pl.cdiv(B, tile_b),)

    # VMEM estimate: double-buffered x + lane-padded double-buffered out +
    # f32 [tile_b, 128] intermediates + resident weights.
    x_bytes = jnp.dtype(x.dtype).itemsize
    est = tile_b * (K_PAD * x_bytes * 2 + HID_DIM * 4 * 2 + HID_DIM * 4 * 3) + (2 << 20)
    vmem_limit = min(MAX_VMEM_LIMIT, max(32 << 20, (est * 3) // 2))

    # Weights/biases: full-array blocks with a constant block index -> stay
    # resident in VMEM across all grid steps.
    def resident(a):
        nd = a.ndim
        return pl.BlockSpec(a.shape, lambda i, _nd=nd: (0,) * _nd)

    return pl.pallas_call(
        mlp_kernel,
        out_shape=jax.ShapeDtypeStruct((B, OUT_DIM), jnp.float32),
        grid=grid,
        in_specs=[
            pl.BlockSpec((tile_b, K_PAD), lambda i: (i, 0)),   # x: batch-tiled
            resident(w1), resident(b1),
            resident(w2), resident(b2),
            resident(w3), resident(b3),
        ],
        out_specs=pl.BlockSpec((tile_b, OUT_DIM), lambda i: (i, 0)),
        compiler_params=pltpu.CompilerParams(
            dimension_semantics=("parallel",),   # shard batch tiles on v7x's 2 TCs
            vmem_limit_bytes=int(vmem_limit),
        ),
    )(x, w1, b1, w2, b2, w3, b3)


def init_params(key, dtype=jnp.float32):
    """Init mirroring nn.Linear's U(-1/sqrt(fan_in), 1/sqrt(fan_in)).

    Weights stored [in, out] in `dtype`; biases stored (1, out) in f32."""
    ks = jax.random.split(key, 6)

    def linear(kw, kb, fan_in, fan_out):
        bound = 1.0 / jnp.sqrt(jnp.float32(fan_in))
        w = jax.random.uniform(kw, (fan_in, fan_out), jnp.float32, -bound, bound)
        b = jax.random.uniform(kb, (1, fan_out), jnp.float32, -bound, bound)
        return w.astype(dtype), b

    w1, b1 = linear(ks[0], ks[1], IN_DIM, HID_DIM)
    w2, b2 = linear(ks[2], ks[3], HID_DIM, HID_DIM)
    w3, b3 = linear(ks[4], ks[5], HID_DIM, OUT_DIM)
    return (w1, b1, w2, b2, w3, b3)


def reference_forward(x, params):
    """Pure-JAX f32 reference."""
    w1, b1, w2, b2, w3, b3 = params
    f32 = lambda a: a.astype(jnp.float32)
    h = jax.nn.leaky_relu(f32(x) @ f32(w1) + f32(b1), NEG_SLOPE)
    h = jax.nn.leaky_relu(h @ f32(w2) + f32(b2), NEG_SLOPE)
    return jnp.tanh(h @ f32(w3) + f32(b3))


if __name__ == "__main__":
    key = jax.random.PRNGKey(0)
    k_param, k_x1, k_x2 = jax.random.split(key, 3)

    params_f32 = init_params(k_param, jnp.float32)

    # --- Check 1: small batch, f32 end-to-end (tight tolerance). ---
    B1 = 8
    x1 = jax.random.normal(k_x1, (B1, IN_DIM), jnp.float32)
    out1 = jax.block_until_ready(quicknn_forward(x1, params_f32))
    ref1 = reference_forward(x1, params_f32)
    assert out1.shape == (B1, OUT_DIM)
    assert jnp.allclose(out1, ref1, atol=1e-5, rtol=1e-5)

    # --- Check 2: multi-tile grid with a padded trailing block (f32). ---
    B2 = 600
    x2 = jax.random.normal(k_x2, (B2, IN_DIM), jnp.float32)
    out2 = jax.block_until_ready(quicknn_forward(x2, params_f32, tile_b=256))
    ref2 = reference_forward(x2, params_f32)
    assert out2.shape == (B2, OUT_DIM)
    assert jnp.allclose(out2, ref2, atol=1e-5, rtol=1e-5)

    # --- Check 3: bf16 weights/input (native MXU rate, f32 accumulation). ---
    params_bf16 = tuple(
        a.astype(jnp.bfloat16) if a.shape[0] != 1 else a for a in params_f32)
    x1_bf16 = x1.astype(jnp.bfloat16)
    out3 = jax.block_until_ready(quicknn_forward(x1_bf16, params_bf16))
    ref3 = reference_forward(x1_bf16, params_bf16)  # f32 math on bf16-rounded data
    assert out3.shape == (B1, OUT_DIM)
    assert bool(jnp.all(jnp.isfinite(out3)))
    assert jnp.allclose(out3, ref3, atol=1e-1)

    print("KERNEL_OK")
</pallas_src>

<mosaic_0001>
module attributes {stable_mosaic.version = 11 : i64} {
  func.func @mlp_kernel(%arg0: i32, %arg1: memref<256x64xf32, #tpu.memory_space<vmem>>, %arg2: memref<64x128xf32, #tpu.memory_space<vmem>>, %arg3: memref<1x128xf32, #tpu.memory_space<vmem>>, %arg4: memref<128x128xf32, #tpu.memory_space<vmem>>, %arg5: memref<1x128xf32, #tpu.memory_space<vmem>>, %arg6: memref<128x7xf32, #tpu.memory_space<vmem>>, %arg7: memref<1x7xf32, #tpu.memory_space<vmem>>, %arg8: memref<256x7xf32, #tpu.memory_space<vmem>>) attributes {dimension_semantics = [#tpu.dimension_semantics<parallel>], iteration_bounds = array<i64: 1>, scalar_prefetch = 0 : i64, scratch_operands = 0 : i64, tpu.core_type = #tpu.core_type<tc>, window_params = [{transform_indices = @transform_0, window_bounds = array<i64: 256, 64>}, {pipeline_mode = #tpu.pipeline_mode<synchronous>, transform_indices = @transform_1, window_bounds = array<i64: 64, 128>}, {pipeline_mode = #tpu.pipeline_mode<synchronous>, transform_indices = @transform_2, window_bounds = array<i64: 1, 128>}, {pipeline_mode = #tpu.pipeline_mode<synchronous>, transform_indices = @transform_3, window_bounds = array<i64: 128, 128>}, {pipeline_mode = #tpu.pipeline_mode<synchronous>, transform_indices = @transform_4, window_bounds = array<i64: 1, 128>}, {pipeline_mode = #tpu.pipeline_mode<synchronous>, transform_indices = @transform_5, window_bounds = array<i64: 128, 7>}, {pipeline_mode = #tpu.pipeline_mode<synchronous>, transform_indices = @transform_6, window_bounds = array<i64: 1, 7>}, {transform_indices = @transform_7, window_bounds = array<i64: 256, 7>}]} {
    %c0 = arith.constant 0 : index
    %c0_0 = arith.constant 0 : index
    %0 = vector.load %arg1[%c0, %c0_0] : memref<256x64xf32, #tpu.memory_space<vmem>>, vector<256x64xf32>
    %c0_1 = arith.constant 0 : index
    %c0_2 = arith.constant 0 : index
    %1 = vector.load %arg2[%c0_1, %c0_2] : memref<64x128xf32, #tpu.memory_space<vmem>>, vector<64x128xf32>
    %cst = arith.constant dense<0.000000e+00> : vector<256x128xf32>
    %2 = tpu.matmul %0, %1, %cst {dimension_numbers = #tpu.dot_dimension_numbers<[1], [0], [0], [1], [0, 0, 1, 1], [], []>} : vector<256x64xf32>, vector<64x128xf32>, vector<256x128xf32> -> vector<256x128xf32>
    %c0_3 = arith.constant 0 : index
    %c0_4 = arith.constant 0 : index
    %3 = vector.load %arg3[%c0_3, %c0_4] : memref<1x128xf32, #tpu.memory_space<vmem>>, vector<1x128xf32>
    %4 = vector.broadcast %3 : vector<1x128xf32> to vector<256x128xf32>
    %5 = arith.addf %2, %4 : vector<256x128xf32>
    %cst_5 = arith.constant 0.000000e+00 : f32
    %6 = vector.broadcast %cst_5 : f32 to vector<256x128xf32>
    %7 = arith.cmpf ogt, %5, %6 : vector<256x128xf32>
    %cst_6 = arith.constant 0.00999999977 : f32
    %8 = vector.broadcast %cst_6 : f32 to vector<256x128xf32>
    %9 = arith.mulf %8, %5 : vector<256x128xf32>
    %10 = arith.select %7, %5, %9 : vector<256x128xi1>, vector<256x128xf32>
    %c0_7 = arith.constant 0 : index
    %c0_8 = arith.constant 0 : index
    %11 = vector.load %arg4[%c0_7, %c0_8] : memref<128x128xf32, #tpu.memory_space<vmem>>, vector<128x128xf32>
    %cst_9 = arith.constant dense<0.000000e+00> : vector<256x128xf32>
    %12 = tpu.matmul %10, %11, %cst_9 {dimension_numbers = #tpu.dot_dimension_numbers<[1], [0], [0], [1], [0, 0, 1, 1], [], []>} : vector<256x128xf32>, vector<128x128xf32>, vector<256x128xf32> -> vector<256x128xf32>
    %c0_10 = arith.constant 0 : index
    %c0_11 = arith.constant 0 : index
    %13 = vector.load %arg5[%c0_10, %c0_11] : memref<1x128xf32, #tpu.memory_space<vmem>>, vector<1x128xf32>
    %14 = vector.broadcast %13 : vector<1x128xf32> to vector<256x128xf32>
    %15 = arith.addf %12, %14 : vector<256x128xf32>
    %cst_12 = arith.constant 0.000000e+00 : f32
    %16 = vector.broadcast %cst_12 : f32 to vector<256x128xf32>
    %17 = arith.cmpf ogt, %15, %16 : vector<256x128xf32>
    %cst_13 = arith.constant 0.00999999977 : f32
    %18 = vector.broadcast %cst_13 : f32 to vector<256x128xf32>
    %19 = arith.mulf %18, %15 : vector<256x128xf32>
    %20 = arith.select %17, %15, %19 : vector<256x128xi1>, vector<256x128xf32>
    %c0_14 = arith.constant 0 : index
    %c0_15 = arith.constant 0 : index
    %21 = vector.load %arg6[%c0_14, %c0_15] : memref<128x7xf32, #tpu.memory_space<vmem>>, vector<128x7xf32>
    %cst_16 = arith.constant dense<0.000000e+00> : vector<256x7xf32>
    %22 = tpu.matmul %20, %21, %cst_16 {dimension_numbers = #tpu.dot_dimension_numbers<[1], [0], [0], [1], [0, 0, 1, 1], [], []>} : vector<256x128xf32>, vector<128x7xf32>, vector<256x7xf32> -> vector<256x7xf32>
    %c0_17 = arith.constant 0 : index
    %c0_18 = arith.constant 0 : index
    %23 = vector.load %arg7[%c0_17, %c0_18] : memref<1x7xf32, #tpu.memory_space<vmem>>, vector<1x7xf32>
    %24 = vector.broadcast %23 : vector<1x7xf32> to vector<256x7xf32>
    %25 = arith.addf %22, %24 : vector<256x7xf32>
    %26 = math.tanh %25 : vector<256x7xf32>
    %c0_19 = arith.constant 0 : index
    %c0_20 = arith.constant 0 : index
    %27 = vector.load %arg8[%c0_19, %c0_20] : memref<256x7xf32, #tpu.memory_space<vmem>>, vector<256x7xf32>
    tpu.vector_store %arg8[%c0_19, %c0_20], %26 {strides = array<i32>} : memref<256x7xf32, #tpu.memory_space<vmem>>, vector<256x7xf32>,
    return
  }
  func.func @transform_0(%arg0: i32) -> (i32, i32) {
    %c0_i32 = arith.constant 0 : i32
    %c0_i32_0 = arith.constant 0 : i32
    return %arg0, %c0_i32 : i32, i32
  }
  func.func @transform_1(%arg0: i32) -> (i32, i32) {
    %c0_i32 = arith.constant 0 : i32
    %c0_i32_0 = arith.constant 0 : i32
    %c0_i32_1 = arith.constant 0 : i32
    return %c0_i32, %c0_i32_0 : i32, i32
  }
  func.func @transform_2(%arg0: i32) -> (i32, i32) {
    %c0_i32 = arith.constant 0 : i32
    %c0_i32_0 = arith.constant 0 : i32
    %c0_i32_1 = arith.constant 0 : i32
    return %c0_i32, %c0_i32_0 : i32, i32
  }
  func.func @transform_3(%arg0: i32) -> (i32, i32) {
    %c0_i32 = arith.constant 0 : i32
    %c0_i32_0 = arith.constant 0 : i32
    %c0_i32_1 = arith.constant 0 : i32
    return %c0_i32, %c0_i32_0 : i32, i32
  }
  func.func @transform_4(%arg0: i32) -> (i32, i32) {
    %c0_i32 = arith.constant 0 : i32
    %c0_i32_0 = arith.constant 0 : i32
    %c0_i32_1 = arith.constant 0 : i32
    return %c0_i32, %c0_i32_0 : i32, i32
  }
  func.func @transform_5(%arg0: i32) -> (i32, i32) {
    %c0_i32 = arith.constant 0 : i32
    %c0_i32_0 = arith.constant 0 : i32
    %c0_i32_1 = arith.constant 0 : i32
    return %c0_i32, %c0_i32_0 : i32, i32
  }
  func.func @transform_6(%arg0: i32) -> (i32, i32) {
    %c0_i32 = arith.constant 0 : i32
    %c0_i32_0 = arith.constant 0 : i32
    %c0_i32_1 = arith.constant 0 : i32
    return %c0_i32, %c0_i32_0 : i32, i32
  }
  func.func @transform_7(%arg0: i32) -> (i32, i32) {
    %c0_i32 = arith.constant 0 : i32
    %c0_i32_0 = arith.constant 0 : i32
    return %arg0, %c0_i32 : i32, i32
  }
}

</mosaic_0001>

<bundles_post_ra>
// kernel: quicknn_forward.1
= control target key start
LH: loop header
LB: loop body
LE: loop exit
PB: predicated region body
PF: predicated region fallthrough
CT: control target
= control target key end

     0   :  { %12 = vsyncpa [#allocation3], 0  ;;  %vm74_vm0 = vcmask 523264   ;;  %s2233_s0 = inlined_call_operand.vmem [shape: f32[8,64], index: 0, kind: input, shape index: {}]   ;;  %s2234_s1 = inlined_call_operand.vmem [shape: f32[64,128], index: 1, kind: input, shape index: {}]   ;;  %s2235_s2 = inlined_call_operand.vmem [shape: f32[1,128], index: 2, kind: input, shape index: {}]   ;;  %s2236_s3 = inlined_call_operand.vmem [shape: f32[128,128], index: 3, kind: input, shape index: {}]   ;;  %s2237_s4 = inlined_call_operand.vmem [shape: f32[1,128], index: 4, kind: input, shape index: {}]   ;;  %s2238_s5 = inlined_call_operand.vmem [shape: f32[128,7], index: 5, kind: input, shape index: {}]   ;;  %s2239_s6 = inlined_call_operand.vmem [shape: f32[1,7], index: 6, kind: input, shape index: {}]   ;;  %s2240_s7 = inlined_call_operand.hbm [shape: f32[8,7], index: 7, kind: output, shape index: {}]  }
   0x1   :  { %v59_v0 = vld [vmem:[%s2234_s1] sm:$0xff]  ;;  %v60_v1 = vld [vmem:[%s2234_s1 + $0x8] sm:$0xff]  ;;  %v61_v3 = vld [vmem:[%s2234_s1 + $0x10] sm:$0xff] }
   0x2   :  { %v1560_v2 = vpack.c.bf16 %v60_v1, %v59_v0  ;;  %v62_v4 = vld [vmem:[%s2234_s1 + $0x18] sm:$0xff]  ;;  %v63_v6 = vld [vmem:[%s2234_s1 + $0x20] sm:$0xff]  ;;  %v64_v7 = vld [vmem:[%s2234_s1 + $0x28] sm:$0xff] }
   0x3   :  { %v1564_v5 = vpack.c.bf16 %v62_v4, %v61_v3  ;;  %v27_v8 = vld [vmem:[%s2233_s0] sm:$0xff]  ;;  %v1568_v9 = vpack.c.bf16 %v64_v7, %v63_v6  ;;  %v65_v10 = vld [vmem:[%s2234_s1 + $0x30] sm:$0xff]  ;;  %v66_v11 = vld [vmem:[%s2234_s1 + $0x38] sm:$0xff] }
   0x4   :  { %1561 = vmatprep.subr.bf16.mxu0 %v1560_v2  ;;  %1640 = vmatprep.subr.bf16.mxu1 %v1560_v2  ;;  %v43_v12 = vld [vmem:[%s2233_s0 + $0x80] sm:$0xff]  ;;  %v1572_v13 = vpack.c.bf16 %v66_v11, %v65_v10  ;;  %v493_v15 = vld [vmem:[%s2236_s3 + $0x8] sm:$0xff]  ;;  %v494_v17 = vld [vmem:[%s2236_s3 + $0x10] sm:$0xff] }
   0x5   :  { %1563 = vmatpush3.bf16.msra.mxu0 %v1560_v2  ;;  %1352 = vmatprep.mubr.msk.f32.mxu0 %vm74_vm0, %v27_v8  ;;  %v492_v14 = vld [vmem:[%s2236_s3] sm:$0xff]  ;;  %v495_v18 = vld [vmem:[%s2236_s3 + $0x18] sm:$0xff]  ;;  %v28_v19 = vld [vmem:[%s2233_s0 + $0x8] sm:$0xff] }
   0x6   :  { %1565 = vmatprep.subr.bf16.mxu0 %v1564_v5  ;;  %1644 = vmatpush3.bf16.msra.mxu1 %v1560_v2  ;;  %v1576_v16 = vpack.c.bf16 %v493_v15, %v492_v14  ;;  %v29_v20 = vld [vmem:[%s2233_s0 + $0x10] sm:$0xff]  ;;  %v44_v21 = vld [vmem:[%s2233_s0 + $0x88] sm:$0xff]  ;;  %v1580_v23 = vpack.c.bf16 %v495_v18, %v494_v17  ;;  %v496_v24 = vld [vmem:[%s2236_s3 + $0x20] sm:$0xff] }
   0x7   :  { %1641 = vmatprep.subr.bf16.mxu1 %v1564_v5  ;;  %1376 = vmatprep.mubr.msk.f32.mxu1 %vm74_vm0, %v43_v12  ;;  %v45_v22 = vld [vmem:[%s2233_s0 + $0x90] sm:$0xff]  ;;  %v497_v25 = vld [vmem:[%s2236_s3 + $0x28] sm:$0xff]  ;;  %v30_v26 = vld [vmem:[%s2233_s0 + $0x18] sm:$0xff] }
   0x8   :  { %v31_v27 = vld [vmem:[%s2233_s0 + $0x20] sm:$0xff]  ;;  %v46_v28 = vld [vmem:[%s2233_s0 + $0x98] sm:$0xff]  ;;  %v1584_v30 = vpack.c.bf16 %v497_v25, %v496_v24  ;;  %v498_v31 = vld [vmem:[%s2236_s3 + $0x30] sm:$0xff] }
   0x9   :  { %1567 = vmatpush3.bf16.msra.mxu0 %v1564_v5  ;;  %v47_v29 = vld [vmem:[%s2233_s0 + $0xa0] sm:$0xff]  ;;  %v499_v32 = vld [vmem:[%s2236_s3 + $0x38] sm:$0xff]  ;;  %v32_v33 = vld [vmem:[%s2233_s0 + $0x28] sm:$0xff] }
   0xa   :  { %1569 = vmatprep.subr.bf16.mxu0 %v1568_v9  ;;  %1645 = vmatpush3.bf16.msra.mxu1 %v1564_v5  ;;  %v33_v34 = vld [vmem:[%s2233_s0 + $0x30] sm:$0xff]  ;;  %v48_v35 = vld [vmem:[%s2233_s0 + $0xa8] sm:$0xff]  ;;  %v1588_v37 = vpack.c.bf16 %v499_v32, %v498_v31  ;;  %v500_v38 = vld [vmem:[%s2236_s3 + $0x40] sm:$0xff] }
   0xb   :  { %1642 = vmatprep.subr.bf16.mxu1 %v1568_v9  ;;  %v49_v36 = vld [vmem:[%s2233_s0 + $0xb0] sm:$0xff]  ;;  %v501_v39 = vld [vmem:[%s2236_s3 + $0x48] sm:$0xff]  ;;  %v34_v40 = vld [vmem:[%s2233_s0 + $0x38] sm:$0xff] }
   0xc   :  { %v35_v41 = vld [vmem:[%s2233_s0 + $0x40] sm:$0xff]  ;;  %v50_v42 = vld [vmem:[%s2233_s0 + $0xb8] sm:$0xff]  ;;  %v1592_v44 = vpack.c.bf16 %v501_v39, %v500_v38  ;;  %v502_v45 = vld [vmem:[%s2236_s3 + $0x50] sm:$0xff] }
   0xd   :  { %1571 = vmatpush3.bf16.msra.mxu0 %v1568_v9  ;;  %v51_v43 = vld [vmem:[%s2233_s0 + $0xc0] sm:$0xff]  ;;  %v503_v46 = vld [vmem:[%s2236_s3 + $0x58] sm:$0xff]  ;;  %v36_v47 = vld [vmem:[%s2233_s0 + $0x48] sm:$0xff] }
   0xe   :  { %1573 = vmatprep.subr.bf16.mxu0 %v1572_v13  ;;  %1646 = vmatpush3.bf16.msra.mxu1 %v1568_v9  ;;  %v37_v48 = vld [vmem:[%s2233_s0 + $0x50] sm:$0xff]  ;;  %v52_v49 = vld [vmem:[%s2233_s0 + $0xc8] sm:$0xff]  ;;  %v1596_v51 = vpack.c.bf16 %v503_v46, %v502_v45  ;;  %v504_v52 = vld [vmem:[%s2236_s3 + $0x60] sm:$0xff] }
   0xf   :  { %1643 = vmatprep.subr.bf16.mxu1 %v1572_v13  ;;  %v53_v50 = vld [vmem:[%s2233_s0 + $0xd0] sm:$0xff]  ;;  %v505_v53 = vld [vmem:[%s2236_s3 + $0x68] sm:$0xff]  ;;  %v38_v54 = vld [vmem:[%s2233_s0 + $0x58] sm:$0xff] }
  0x10   :  { %v39_v55 = vld [vmem:[%s2233_s0 + $0x60] sm:$0xff]  ;;  %v54_v56 = vld [vmem:[%s2233_s0 + $0xd8] sm:$0xff]  ;;  %v1600_v58 = vpack.c.bf16 %v505_v53, %v504_v52  ;;  %v40_v59 = vld [vmem:[%s2233_s0 + $0x68] sm:$0xff] }
  0x11   :  { %1575 = vmatpush3.bf16.msra.mxu0 %v1572_v13  ;;  %v55_v57 = vld [vmem:[%s2233_s0 + $0xe0] sm:$0xff]  ;;  %v41_v60 = vld [vmem:[%s2233_s0 + $0x70] sm:$0xff]  ;;  %v56_v61 = vld [vmem:[%s2233_s0 + $0xe8] sm:$0xff] }
  0x12   :  { %1647 = vmatpush3.bf16.msra.mxu1 %v1572_v13  ;;  %v57_v62 = vld [vmem:[%s2233_s0 + $0xf0] sm:$0xff]  ;;  %v42_v63 = vld [vmem:[%s2233_s0 + $0x78] sm:$0xff]  ;;  %v836_v4 = vld [vmem:[%s2238_s5] sm:$0xff] }
  0x13   :  { %1577 = vmatprep.subr.bf16.mxu1 %v1576_v16  ;;  %v58_v0 = vld [vmem:[%s2233_s0 + $0xf8] sm:$0xff]  ;;  %v506_v1 = vld [vmem:[%s2236_s3 + $0x70] sm:$0xff]  ;;  %v837_v5 = vld [vmem:[%s2238_s5 + $0x8] sm:$0xff] }
  0x14   :  { %1353 = vmatmul.mubr.msk.f32.vlgmr.msra.gmra.mrb[0].mxu0 %vm74_vm0, %v28_v19  ;;  %v507_v2 = vld [vmem:[%s2236_s3 + $0x78] sm:$0xff]  ;;  %v838_v6 = vld [vmem:[%s2238_s5 + $0x10] sm:$0xff]  ;;  %v1608_v7 = vpack.c.bf16 %v837_v5, %v836_v4  ;;  %v840_v10 = vld [vmem:[%s2238_s5 + $0x20] sm:$0xff] }
  0x15   :  { %1355 = vmatprep.mubr.msk.f32.mxu0 %vm74_vm0, %v29_v20  ;;  %1377 = vmatmul.mubr.msk.f32.vlgmr.msra.gmra.mrb[0].mxu1 %vm74_vm0, %v44_v21  ;;  %v1604_v3 = vpack.c.bf16 %v507_v2, %v506_v1  ;;  %v839_v8 = vld [vmem:[%s2238_s5 + $0x18] sm:$0xff]  ;;  %v841_v11 = vld [vmem:[%s2238_s5 + $0x28] sm:$0xff]  ;;  %v842_v13 = vld [vmem:[%s2238_s5 + $0x30] sm:$0xff] }
  0x16   :  { %1379 = vmatprep.mubr.msk.f32.mxu1 %vm74_vm0, %v45_v22  ;;  %1579 = vmatpush3.bf16.msra.mxu1 %v1576_v16  ;;  %v1612_v9 = vpack.c.bf16 %v839_v8, %v838_v6  ;;  %v1616_v12 = vpack.c.bf16 %v841_v11, %v840_v10  ;;  %v843_v14 = vld [vmem:[%s2238_s5 + $0x38] sm:$0xff]  ;;  %v844_v16 = vld [vmem:[%s2238_s5 + $0x40] sm:$0xff]  ;;  %v845_v17 = vld [vmem:[%s2238_s5 + $0x48] sm:$0xff] }
  0x17   :  { %1581 = vmatprep.subr.bf16.mxu1 %v1580_v23  ;;  %1609 = vmatprep.subr.bf16.mxu0 %v1608_v7  ;;  %v1620_v15 = vpack.c.bf16 %v843_v14, %v842_v13  ;;  %v1624_v18 = vpack.c.bf16 %v845_v17, %v844_v16  ;;  %v846_v19 = vld [vmem:[%s2238_s5 + $0x50] sm:$0xff]  ;;  %v847_v20 = vld [vmem:[%s2238_s5 + $0x58] sm:$0xff]  ;;  %v848_v22 = vld [vmem:[%s2238_s5 + $0x60] sm:$0xff] }
  0x18   :  { %1356 = vmatmul.mubr.msk.f32.gmra.mrb[2].mxu0 %vm74_vm0, %v30_v26  ;;  %v1628_v21 = vpack.c.bf16 %v847_v20, %v846_v19  ;;  %v2027_v25 = vld [vmem:[%s2235_s2] ss:$0 sm:$0xff] }
  0x19   :  { %1358 = vmatprep.mubr.msk.f32.mxu0 %vm74_vm0, %v31_v27  ;;  %1380 = vmatmul.mubr.msk.f32.gmra.mrb[2].mxu1 %vm74_vm0, %v46_v28 }
  0x1a   :  { %1382 = vmatprep.mubr.msk.f32.mxu1 %vm74_vm0, %v47_v29  ;;  %1583 = vmatpush3.bf16.msra.mxu1 %v1580_v23  ;;  %v849_v23 = vld [vmem:[%s2238_s5 + $0x68] sm:$0xff] }
  0x1b   :  { %1585 = vmatprep.subr.bf16.mxu1 %v1584_v30  ;;  %1611 = vmatpush3.bf16.msra.mxu0 %v1608_v7  ;;  %v1632_v24 = vpack.c.bf16 %v849_v23, %v848_v22 }
  0x1c   :  { %1359 = vmatmul.mubr.msk.f32.gmra.mrb[4].mxu0 %vm74_vm0, %v32_v33  ;;  %1613 = vmatprep.subr.bf16.mxu0 %v1612_v9 }
  0x1d   :  { %1361 = vmatprep.mubr.msk.f32.mxu0 %vm74_vm0, %v33_v34  ;;  %1383 = vmatmul.mubr.msk.f32.gmra.mrb[4].mxu1 %vm74_vm0, %v48_v35 }
  0x1e   :  { %1385 = vmatprep.mubr.msk.f32.mxu1 %vm74_vm0, %v49_v36  ;;  %1587 = vmatpush3.bf16.msra.mxu1 %v1584_v30 }
  0x1f   :  { %1589 = vmatprep.subr.bf16.mxu1 %v1588_v37  ;;  %1615 = vmatpush3.bf16.msra.mxu0 %v1612_v9 }
  0x20   :  { %1362 = vmatmul.mubr.msk.f32.gmra.mrb[6].mxu0 %vm74_vm0, %v34_v40  ;;  %1617 = vmatprep.subr.bf16.mxu0 %v1616_v12 }
  0x21   :  { %1364 = vmatprep.mubr.msk.f32.mxu0 %vm74_vm0, %v35_v41  ;;  %1386 = vmatmul.mubr.msk.f32.gmra.mrb[6].mxu1 %vm74_vm0, %v50_v42 }
  0x22   :  { %1388 = vmatprep.mubr.msk.f32.mxu1 %vm74_vm0, %v51_v43  ;;  %1591 = vmatpush3.bf16.msra.mxu1 %v1588_v37 }
  0x23   :  { %1593 = vmatprep.subr.bf16.mxu1 %v1592_v44  ;;  %1619 = vmatpush3.bf16.msra.mxu0 %v1616_v12 }
  0x24   :  { %1365 = vmatmul.mubr.msk.f32.gmra.mrb[8].mxu0 %vm74_vm0, %v36_v47  ;;  %1621 = vmatprep.subr.bf16.mxu0 %v1620_v15 }
  0x25   :  { %1367 = vmatprep.mubr.msk.f32.mxu0 %vm74_vm0, %v37_v48  ;;  %1389 = vmatmul.mubr.msk.f32.gmra.mrb[8].mxu1 %vm74_vm0, %v52_v49 }
  0x26   :  { %1391 = vmatprep.mubr.msk.f32.mxu1 %vm74_vm0, %v53_v50  ;;  %1595 = vmatpush3.bf16.msra.mxu1 %v1592_v44 }
  0x27   :  { %1597 = vmatprep.subr.bf16.mxu1 %v1596_v51  ;;  %1623 = vmatpush3.bf16.msra.mxu0 %v1620_v15 }
  0x28   :  { %1368 = vmatmul.mubr.msk.f32.gmra.mrb[10].mxu0 %vm74_vm0, %v38_v54  ;;  %1625 = vmatprep.subr.bf16.mxu0 %v1624_v18 }
  0x29   :  { %1370 = vmatprep.mubr.msk.f32.mxu0 %vm74_vm0, %v39_v55  ;;  %1392 = vmatmul.mubr.msk.f32.gmra.mrb[10].mxu1 %vm74_vm0, %v54_v56 }
  0x2a   :  { %1394 = vmatprep.mubr.msk.f32.mxu1 %vm74_vm0, %v55_v57  ;;  %1599 = vmatpush3.bf16.msra.mxu1 %v1596_v51 }
  0x2b   :  { %1601 = vmatprep.subr.bf16.mxu1 %v1600_v58  ;;  %1627 = vmatpush3.bf16.msra.mxu0 %v1624_v18 }
  0x2c   :  { %1371 = vmatmul.mubr.msk.f32.gmra.mrb[12].mxu0 %vm74_vm0, %v40_v59  ;;  %1629 = vmatprep.subr.bf16.mxu0 %v1628_v21 }
  0x2d   :  { %1373 = vmatprep.mubr.msk.f32.mxu0 %vm74_vm0, %v41_v60  ;;  %1395 = vmatmul.mubr.msk.f32.gmra.mrb[12].mxu1 %vm74_vm0, %v56_v61 }
  0x2e   :  { %1397 = vmatprep.mubr.msk.f32.mxu1 %vm74_vm0, %v57_v62  ;;  %1603 = vmatpush3.bf16.msra.mxu1 %v1600_v58 }
  0x2f   :  { %1605 = vmatprep.subr.bf16.mxu1 %v1604_v3  ;;  %1631 = vmatpush3.bf16.msra.mxu0 %v1628_v21 }
  0x30   :  { %1374 = vmatmul.mubr.msk.f32.gmra.mrb[14].mxu0 %vm74_vm0, %v42_v63  ;;  %1633 = vmatprep.subr.bf16.mxu0 %v1632_v24 }
  0x31   :  { %1398 = vmatmul.mubr.msk.f32.gmra.mrb[14].mxu1 %vm74_vm0, %v58_v0 }
  0x32   :  { %1607 = vmatpush3.bf16.msra.mxu1 %v1604_v3 }
  0x33   :  { %1635 = vmatpush3.bf16.msra.mxu0 %v1632_v24 }
  0xe7   :  { %v1354_v26 = vpop.f32.mrb[0].mxu0 }
  0xe8   :  { %v243_v27 = vadd.f32 %v1354_v26, %v2027_v25  ;;  %v237_v28 = vpop.f32.mrb[1].mxu0  ;;  %v2030_v29 = vpop.f32.mrb[0].mxu1 }
  0xe9   :  { %v238_v30 = vadd.f32 %v2027_v25, %v237_v28  ;;  %v2033_v31 = vpop.f32.mrb[1].mxu1 }
  0xea   :  { %v429_v32 = vmul.f32 0.01, %v243_v27  ;;  %vm397_vm1 = vcmp.gt.f32.partialorder %v243_v27, 0.0 }
  0xeb   :  { %v428_v33 = vmul.f32 0.01, %v238_v30  ;;  %v1357_v34 = vpop.f32.mrb[2].mxu0  ;;  %vm396_vm2 = vcmp.gt.f32.partialorder %v238_v30, 0.0 }
  0xec   :  { %v253_v35 = vadd.f32 %v1357_v34, %v2027_v25  ;;  %v247_v36 = vpop.f32.mrb[3].mxu0  ;;  %v2036_v37 = vpop.f32.mrb[2].mxu1  ;;  %v461_v41 = vsel %vm397_vm1, %v243_v27, %v429_v32  ;;  %v318_v27 = vadd.f32 %v2027_v25, %v2033_v31 }
  0xed   :  { %v248_v38 = vadd.f32 %v2027_v25, %v247_v36  ;;  %v460_v39 = vsel %vm396_vm2, %v238_v30, %v428_v33  ;;  %v2039_v40 = vpop.f32.mrb[3].mxu1 }
  0xee   :  { %v431_v42 = vmul.f32 0.01, %v253_v35  ;;  %1432 = vmatprep.mubr.f32.mxu1 %v460_v39  ;;  %vm399_vm4 = vcmp.gt.f32.partialorder %v253_v35, 0.0  ;;  %v328_v31 = vadd.f32 %v2027_v25, %v2039_v40  ;;  %vm412_vm15 = vcmp.gt.f32.partialorder %v318_v27, 0.0 }
  0xef   :  { %v430_v43 = vmul.f32 0.01, %v248_v38  ;;  %v1360_v44 = vpop.f32.mrb[4].mxu0  ;;  %1433 = vmatmul.mubr.f32.vlgmr.msra.gmra.mrb[16].mxu1 %v461_v41  ;;  %vm398_vm3 = vcmp.gt.f32.partialorder %v248_v38, 0.0  ;;  %v444_v41 = vmul.f32 0.01, %v318_v27 }
  0xf0   :  { %v263_v45 = vadd.f32 %v1360_v44, %v2027_v25  ;;  %v257_v46 = vpop.f32.mrb[5].mxu0  ;;  %v2042_v47 = vpop.f32.mrb[4].mxu1  ;;  %v463_v52 = vsel %vm399_vm4, %v253_v35, %v431_v42  ;;  %vm414_vm2 = vcmp.gt.f32.partialorder %v328_v31, 0.0 }
  0xf1   :  { %v258_v48 = vadd.f32 %v2027_v25, %v257_v46  ;;  %v462_v49 = vsel %vm398_vm3, %v248_v38, %v430_v43  ;;  %v2045_v50 = vpop.f32.mrb[5].mxu1 }
  0xf2   :  { %v433_v51 = vmul.f32 0.01, %v263_v45  ;;  %1435 = vmatprep.mubr.f32.mxu1 %v462_v49  ;;  %vm401_vm6 = vcmp.gt.f32.partialorder %v263_v45, 0.0  ;;  %v446_v49 = vmul.f32 0.01, %v328_v31 }
  0xf3   :  { %v432_v53 = vmul.f32 0.01, %v258_v48  ;;  %v1363_v54 = vpop.f32.mrb[6].mxu0  ;;  %1436 = vmatmul.mubr.f32.gmra.mrb[18].mxu1 %v463_v52  ;;  %vm400_vm5 = vcmp.gt.f32.partialorder %v258_v48, 0.0  ;;  %v476_v52 = vsel %vm412_vm15, %v318_v27, %v444_v41 }
  0xf4   :  { %v273_v55 = vadd.f32 %v1363_v54, %v2027_v25  ;;  %v267_v56 = vpop.f32.mrb[7].mxu0  ;;  %v2048_v57 = vpop.f32.mrb[6].mxu1  ;;  %v465_v62 = vsel %vm401_vm6, %v263_v45, %v433_v51  ;;  %v323_v45 = vadd.f32 %v2030_v29, %v2027_v25  ;;  %v333_v54 = vadd.f32 %v2036_v37, %v2027_v25 }
  0xf5   :  { %v268_v58 = vadd.f32 %v2027_v25, %v267_v56  ;;  %v464_v59 = vsel %vm400_vm5, %v258_v48, %v432_v53  ;;  %v2051_v60 = vpop.f32.mrb[7].mxu1  ;;  %v338_v53 = vadd.f32 %v2027_v25, %v2045_v50  ;;  %v478_v56 = vsel %vm414_vm2, %v328_v31, %v446_v49 }
  0xf6   :  { %v435_v61 = vmul.f32 0.01, %v273_v55  ;;  %1438 = vmatprep.mubr.f32.mxu1 %v464_v59  ;;  %vm403_vm8 = vcmp.gt.f32.partialorder %v273_v55, 0.0  ;;  %v445_v40 = vmul.f32 0.01, %v323_v45  ;;  %vm413_vm3 = vcmp.gt.f32.partialorder %v323_v45, 0.0 }
  0xf7   :  { %v434_v63 = vmul.f32 0.01, %v268_v58  ;;  %v1366_v0 = vpop.f32.mrb[8].mxu0  ;;  %1439 = vmatmul.mubr.f32.gmra.mrb[20].mxu1 %v465_v62  ;;  %vm402_vm7 = vcmp.gt.f32.partialorder %v268_v58, 0.0  ;;  %v448_v29 = vmul.f32 0.01, %v338_v53 }
  0xf8   :  { %v283_v1 = vadd.f32 %v1366_v0, %v2027_v25  ;;  %v277_v2 = vpop.f32.mrb[9].mxu0  ;;  %v2054_v3 = vpop.f32.mrb[8].mxu1  ;;  %v467_v8 = vsel %vm403_vm8, %v273_v55, %v435_v61  ;;  %v447_v59 = vmul.f32 0.01, %v333_v54  ;;  %v343_v61 = vadd.f32 %v2042_v47, %v2027_v25 }
  0xf9   :  { %v278_v4 = vadd.f32 %v2027_v25, %v277_v2  ;;  %v466_v5 = vsel %vm402_vm7, %v268_v58, %v434_v63  ;;  %v2057_v6 = vpop.f32.mrb[9].mxu1  ;;  %v348_v58 = vadd.f32 %v2027_v25, %v2051_v60  ;;  %v477_v50 = vsel %vm413_vm3, %v323_v45, %v445_v40 }
  0xfa   :  { %v437_v7 = vmul.f32 0.01, %v283_v1  ;;  %1441 = vmatprep.mubr.f32.mxu1 %v466_v5  ;;  %vm405_vm10 = vcmp.gt.f32.partialorder %v283_v1, 0.0  ;;  %vm416_vm4 = vcmp.gt.f32.partialorder %v338_v53, 0.0  ;;  %vm415_vm5 = vcmp.gt.f32.partialorder %v333_v54, 0.0 }
  0xfb   :  { %v436_v9 = vmul.f32 0.01, %v278_v4  ;;  %v1369_v10 = vpop.f32.mrb[10].mxu0  ;;  %1442 = vmatmul.mubr.f32.gmra.mrb[22].mxu1 %v467_v8  ;;  %vm404_vm9 = vcmp.gt.f32.partialorder %v278_v4, 0.0  ;;  %v450_v37 = vmul.f32 0.01, %v348_v58  ;;  %v480_v62 = vsel %vm416_vm4, %v338_v53, %v448_v29 }
  0xfc   :  { %v293_v11 = vadd.f32 %v1369_v10, %v2027_v25  ;;  %v287_v12 = vpop.f32.mrb[11].mxu0  ;;  %v2060_v13 = vpop.f32.mrb[10].mxu1  ;;  %v469_v18 = vsel %vm405_vm10, %v283_v1, %v437_v7  ;;  %v358_v63 = vadd.f32 %v2027_v25, %v2057_v6  ;;  %v449_v0 = vmul.f32 0.01, %v343_v61 }
  0xfd   :  { %v288_v14 = vadd.f32 %v2027_v25, %v287_v12  ;;  %v468_v15 = vsel %vm404_vm9, %v278_v4, %v436_v9  ;;  %v2063_v16 = vpop.f32.mrb[11].mxu1  ;;  %v353_v1 = vadd.f32 %v2048_v57, %v2027_v25  ;;  %v479_v2 = vsel %vm415_vm5, %v333_v54, %v447_v59 }
  0xfe   :  { %v439_v17 = vmul.f32 0.01, %v293_v11  ;;  %1444 = vmatprep.mubr.f32.mxu1 %v468_v15  ;;  %vm407_vm12 = vcmp.gt.f32.partialorder %v293_v11, 0.0  ;;  %vm418_vm6 = vcmp.gt.f32.partialorder %v348_v58, 0.0  ;;  %vm417_vm7 = vcmp.gt.f32.partialorder %v343_v61, 0.0 }
  0xff   :  { %v438_v19 = vmul.f32 0.01, %v288_v14  ;;  %v1372_v20 = vpop.f32.mrb[12].mxu0  ;;  %1445 = vmatmul.mubr.f32.gmra.mrb[24].mxu1 %v469_v18  ;;  %vm406_vm11 = vcmp.gt.f32.partialorder %v288_v14, 0.0  ;;  %v452_v47 = vmul.f32 0.01, %v358_v63  ;;  %v482_v60 = vsel %vm418_vm6, %v348_v58, %v450_v37 }
 0x100   :  { %v303_v21 = vadd.f32 %v1372_v20, %v2027_v25  ;;  %v297_v22 = vpop.f32.mrb[13].mxu0  ;;  %v2066_v23 = vpop.f32.mrb[12].mxu1  ;;  %v471_v32 = vsel %vm407_vm12, %v293_v11, %v439_v17  ;;  %v368_v4 = vadd.f32 %v2027_v25, %v2063_v16  ;;  %v451_v5 = vmul.f32 0.01, %v353_v1 }
 0x101   :  { %v298_v24 = vadd.f32 %v2027_v25, %v297_v22  ;;  %v470_v26 = vsel %vm406_vm11, %v288_v14, %v438_v19  ;;  %v2071_v28 = vpop.f32.mrb[13].mxu1  ;;  %v363_v7 = vadd.f32 %v2054_v3, %v2027_v25  ;;  %v481_v8 = vsel %vm417_vm7, %v343_v61, %v449_v0 }
 0x102   :  { %v441_v30 = vmul.f32 0.01, %v303_v21  ;;  %1447 = vmatprep.mubr.f32.mxu1 %v470_v26  ;;  %vm409_vm14 = vcmp.gt.f32.partialorder %v303_v21, 0.0  ;;  %vm420_vm8 = vcmp.gt.f32.partialorder %v358_v63, 0.0  ;;  %vm419_vm9 = vcmp.gt.f32.partialorder %v353_v1, 0.0 }
 0x103   :  { %v440_v33 = vmul.f32 0.01, %v298_v24  ;;  %v1375_v34 = vpop.f32.mrb[14].mxu0  ;;  %1448 = vmatmul.mubr.f32.gmra.mrb[26].mxu1 %v471_v32  ;;  %vm408_vm13 = vcmp.gt.f32.partialorder %v298_v24, 0.0  ;;  %v454_v57 = vmul.f32 0.01, %v368_v4  ;;  %v484_v6 = vsel %vm420_vm8, %v358_v63, %v452_v47 }
 0x104   :  { %v313_v35 = vadd.f32 %v1375_v34, %v2027_v25  ;;  %v307_v36 = vpop.f32.mrb[15].mxu0  ;;  %v2074_v38 = vpop.f32.mrb[14].mxu1  ;;  %v473_v46 = vsel %vm409_vm14, %v303_v21, %v441_v30  ;;  %v378_v9 = vadd.f32 %v2027_v25, %v2071_v28  ;;  %v453_v10 = vmul.f32 0.01, %v363_v7  ;;  %v850_v28 = vld [vmem:[%s2238_s5 + $0x70] sm:$0xff] }
 0x105   :  { %v308_v39 = vadd.f32 %v2027_v25, %v307_v36  ;;  %v472_v42 = vsel %vm408_vm13, %v298_v24, %v440_v33  ;;  %v2079_v43 = vpop.f32.mrb[15].mxu1  ;;  %v373_v11 = vadd.f32 %v2060_v13, %v2027_v25  ;;  %v483_v12 = vsel %vm419_vm9, %v353_v1, %v451_v5  ;;  %v2118_v32 = vld [vmem:[%s2237_s4] ss:$0 sm:$0xff] }
 0x106   :  { %v443_v44 = vmul.f32 0.01, %v313_v35  ;;  %1450 = vmatprep.mubr.f32.mxu1 %v472_v42  ;;  %vm411_vm1 = vcmp.gt.f32.partialorder %v313_v35, 0.0  ;;  %vm422_vm10 = vcmp.gt.f32.partialorder %v368_v4, 0.0  ;;  %vm421_vm11 = vcmp.gt.f32.partialorder %v363_v7, 0.0 }
 0x107   :  { %v442_v48 = vmul.f32 0.01, %v308_v39  ;;  %1451 = vmatmul.mubr.f32.gmra.mrb[28].mxu1 %v473_v46  ;;  %vm410_vm0 = vcmp.gt.f32.partialorder %v308_v39, 0.0  ;;  %v456_v3 = vmul.f32 0.01, %v378_v9  ;;  %v486_v14 = vsel %vm422_vm10, %v368_v4, %v454_v57 }
 0x108   :  { %v475_v55 = vsel %vm411_vm1, %v313_v35, %v443_v44  ;;  %v388_v15 = vadd.f32 %v2027_v25, %v2079_v43  ;;  %v455_v16 = vmul.f32 0.01, %v373_v11  ;;  %v383_v17 = vadd.f32 %v2066_v23, %v2027_v25 }
 0x109   :  { %v474_v51 = vsel %vm410_vm0, %v308_v39, %v442_v48  ;;  %v485_v18 = vsel %vm421_vm11, %v363_v7, %v453_v10  ;;  %vm424_vm12 = vcmp.gt.f32.partialorder %v378_v9, 0.0  ;;  %vm423_vm13 = vcmp.gt.f32.partialorder %v373_v11, 0.0 }
 0x10a   :  { %1453 = vmatprep.mubr.f32.mxu1 %v474_v51  ;;  %v458_v13 = vmul.f32 0.01, %v388_v15  ;;  %v488_v19 = vsel %vm424_vm12, %v378_v9, %v456_v3  ;;  %v457_v20 = vmul.f32 0.01, %v383_v17  ;;  %v393_v21 = vadd.f32 %v2074_v38, %v2027_v25  ;;  %v851_v25 = vld [vmem:[%s2238_s5 + $0x78] sm:$0xff] }
 0x10b   :  { %1454 = vmatmul.mubr.f32.gmra.mrb[30].mxu1 %v475_v55  ;;  %v487_v22 = vsel %vm423_vm13, %v373_v11, %v455_v16  ;;  %vm426_vm14 = vcmp.gt.f32.partialorder %v388_v15, 0.0  ;;  %vm425_vm15 = vcmp.gt.f32.partialorder %v383_v17, 0.0  ;;  %v1636_v30 = vpack.c.bf16 %v851_v25, %v850_v28 }
 0x10c   :  { %1456 = vmatprep.mubr.f32.mxu1 %v476_v52  ;;  %v490_v24 = vsel %vm426_vm14, %v388_v15, %v458_v13  ;;  %v459_v26 = vmul.f32 0.01, %v393_v21  ;;  %v489_v27 = vsel %vm425_vm15, %v383_v17, %v457_v20  ;;  %vm427_vm0 = vcmp.gt.f32.partialorder %v393_v21, 0.0 }
 0x10d   :  { %1637 = vmatprep.subr.bf16.mxu0 %v1636_v30 }
 0x10e   :  { %v491_v23 = vsel %vm427_vm0, %v393_v21, %v459_v26  ;;  %1639 = vmatpush3.bf16.msra.mxu0 %v1636_v30 }
 0x10f   :  { %1457 = vmatmul.mubr.f32.gmra.mrb[32].mxu1 %v477_v50 }
 0x110   :  { %1459 = vmatprep.mubr.f32.mxu1 %v478_v56 }
 0x113   :  { %1460 = vmatmul.mubr.f32.gmra.mrb[34].mxu1 %v479_v2 }
 0x114   :  { %1462 = vmatprep.mubr.f32.mxu1 %v480_v62 }
 0x117   :  { %1463 = vmatmul.mubr.f32.gmra.mrb[36].mxu1 %v481_v8 }
 0x118   :  { %1465 = vmatprep.mubr.f32.mxu1 %v482_v60 }
 0x11b   :  { %1466 = vmatmul.mubr.f32.gmra.mrb[38].mxu1 %v483_v12 }
 0x11c   :  { %1468 = vmatprep.mubr.f32.mxu1 %v484_v6 }
 0x11f   :  { %1469 = vmatmul.mubr.f32.gmra.mrb[40].mxu1 %v485_v18 }
 0x120   :  { %1471 = vmatprep.mubr.f32.mxu1 %v486_v14 }
 0x123   :  { %1472 = vmatmul.mubr.f32.gmra.mrb[42].mxu1 %v487_v22 }
 0x124   :  { %1474 = vmatprep.mubr.f32.mxu1 %v488_v19 }
 0x127   :  { %1475 = vmatmul.mubr.f32.gmra.mrb[44].mxu1 %v489_v27 }
 0x128   :  { %1477 = vmatprep.mubr.f32.mxu1 %v490_v24 }
 0x12b   :  { %1478 = vmatmul.mubr.f32.gmra.mrb[46].mxu1 %v491_v23 }
 0x1c2   :  { %v1434_v33 = vpop.f32.mrb[16].mxu1 }
 0x1c3   :  { %v587_v34 = vadd.f32 %v1434_v33, %v2118_v32  ;;  %v581_v35 = vpop.f32.mrb[17].mxu1 }
 0x1c4   :  { %v582_v36 = vadd.f32 %v2118_v32, %v581_v35 }
 0x1c5   :  { %v773_v38 = vmul.f32 0.01, %v587_v34  ;;  %vm741_vm1 = vcmp.gt.f32.partialorder %v587_v34, 0.0 }
 0x1c6   :  { %v772_v39 = vmul.f32 0.01, %v582_v36  ;;  %v1437_v41 = vpop.f32.mrb[18].mxu1  ;;  %vm740_vm2 = vcmp.gt.f32.partialorder %v582_v36, 0.0 }
 0x1c7   :  { %v597_v42 = vadd.f32 %v1437_v41, %v2118_v32  ;;  %v591_v31 = vpop.f32.mrb[19].mxu1  ;;  %v805_v45 = vsel %vm741_vm1, %v587_v34, %v773_v38 }
 0x1c8   :  { %v592_v43 = vadd.f32 %v2118_v32, %v591_v31  ;;  %v804_v44 = vsel %vm740_vm2, %v582_v36, %v772_v39 }
 0x1c9   :  { %v775_v46 = vmul.f32 0.01, %v597_v42  ;;  %1512 = vmatprep.mubr.f32.mxu0 %v804_v44  ;;  %vm743_vm4 = vcmp.gt.f32.partialorder %v597_v42, 0.0 }
 0x1ca   :  { %v774_v48 = vmul.f32 0.01, %v592_v43  ;;  %v1440_v49 = vpop.f32.mrb[20].mxu1  ;;  %1513 = vmatmul.mubr.f32.vlgmr.msra.gmra.mrb[16].mxu0 %v805_v45  ;;  %vm742_vm3 = vcmp.gt.f32.partialorder %v592_v43, 0.0 }
 0x1cb   :  { %v607_v51 = vadd.f32 %v1440_v49, %v2118_v32  ;;  %v601_v52 = vpop.f32.mrb[21].mxu1  ;;  %v807_v55 = vsel %vm743_vm4, %v597_v42, %v775_v46 }
 0x1cc   :  { %v602_v53 = vadd.f32 %v2118_v32, %v601_v52  ;;  %v806_v40 = vsel %vm742_vm3, %v592_v43, %v774_v48 }
 0x1cd   :  { %v777_v54 = vmul.f32 0.01, %v607_v51  ;;  %1515 = vmatprep.mubr.f32.mxu0 %v806_v40  ;;  %vm745_vm6 = vcmp.gt.f32.partialorder %v607_v51, 0.0 }
 0x1ce   :  { %v776_v29 = vmul.f32 0.01, %v602_v53  ;;  %v1443_v56 = vpop.f32.mrb[22].mxu1  ;;  %1516 = vmatmul.mubr.f32.gmra.mrb[18].mxu0 %v807_v55  ;;  %vm744_vm5 = vcmp.gt.f32.partialorder %v602_v53, 0.0 }
 0x1cf   :  { %v617_v58 = vadd.f32 %v1443_v56, %v2118_v32  ;;  %v611_v59 = vpop.f32.mrb[23].mxu1  ;;  %v809_v62 = vsel %vm745_vm6, %v607_v51, %v777_v54 }
 0x1d0   :  { %v612_v61 = vadd.f32 %v2118_v32, %v611_v59  ;;  %v808_v50 = vsel %vm744_vm5, %v602_v53, %v776_v29 }
 0x1d1   :  { %v779_v37 = vmul.f32 0.01, %v617_v58  ;;  %1518 = vmatprep.mubr.f32.mxu0 %v808_v50  ;;  %vm747_vm8 = vcmp.gt.f32.partialorder %v617_v58, 0.0 }
 0x1d2   :  { %v778_v63 = vmul.f32 0.01, %v612_v61  ;;  %v1446_v0 = vpop.f32.mrb[24].mxu1  ;;  %1519 = vmatmul.mubr.f32.gmra.mrb[20].mxu0 %v809_v62  ;;  %vm746_vm7 = vcmp.gt.f32.partialorder %v612_v61, 0.0 }
 0x1d3   :  { %v627_v1 = vadd.f32 %v1446_v0, %v2118_v32  ;;  %v621_v2 = vpop.f32.mrb[25].mxu1  ;;  %v811_v5 = vsel %vm747_vm8, %v617_v58, %v779_v37 }
 0x1d4   :  { %v622_v47 = vadd.f32 %v2118_v32, %v621_v2  ;;  %v810_v60 = vsel %vm746_vm7, %v612_v61, %v778_v63 }
 0x1d5   :  { %v781_v4 = vmul.f32 0.01, %v627_v1  ;;  %1521 = vmatprep.mubr.f32.mxu0 %v810_v60  ;;  %vm749_vm10 = vcmp.gt.f32.partialorder %v627_v1, 0.0 }
 0x1d6   :  { %v780_v7 = vmul.f32 0.01, %v622_v47  ;;  %v1449_v8 = vpop.f32.mrb[26].mxu1  ;;  %1522 = vmatmul.mubr.f32.gmra.mrb[22].mxu0 %v811_v5  ;;  %vm748_vm9 = vcmp.gt.f32.partialorder %v622_v47, 0.0 }
 0x1d7   :  { %v637_v57 = vadd.f32 %v1449_v8, %v2118_v32  ;;  %v631_v6 = vpop.f32.mrb[27].mxu1  ;;  %v813_v12 = vsel %vm749_vm10, %v627_v1, %v781_v4 }
 0x1d8   :  { %v632_v9 = vadd.f32 %v2118_v32, %v631_v6  ;;  %v812_v10 = vsel %vm748_vm9, %v622_v47, %v780_v7 }
 0x1d9   :  { %v783_v11 = vmul.f32 0.01, %v637_v57  ;;  %1524 = vmatprep.mubr.f32.mxu0 %v812_v10  ;;  %vm751_vm12 = vcmp.gt.f32.partialorder %v637_v57, 0.0 }
 0x1da   :  { %v782_v3 = vmul.f32 0.01, %v632_v9  ;;  %v1452_v14 = vpop.f32.mrb[28].mxu1  ;;  %1525 = vmatmul.mubr.f32.gmra.mrb[24].mxu0 %v813_v12  ;;  %vm750_vm11 = vcmp.gt.f32.partialorder %v632_v9, 0.0 }
 0x1db   :  { %v647_v15 = vadd.f32 %v1452_v14, %v2118_v32  ;;  %v641_v16 = vpop.f32.mrb[29].mxu1  ;;  %v815_v19 = vsel %vm751_vm12, %v637_v57, %v783_v11 }
 0x1dc   :  { %v642_v17 = vadd.f32 %v2118_v32, %v641_v16  ;;  %v814_v18 = vsel %vm750_vm11, %v632_v9, %v782_v3 }
 0x1dd   :  { %v785_v13 = vmul.f32 0.01, %v647_v15  ;;  %1527 = vmatprep.mubr.f32.mxu0 %v814_v18  ;;  %vm753_vm14 = vcmp.gt.f32.partialorder %v647_v15, 0.0 }
 0x1de   :  { %v784_v20 = vmul.f32 0.01, %v642_v17  ;;  %v1455_v21 = vpop.f32.mrb[30].mxu1  ;;  %1528 = vmatmul.mubr.f32.gmra.mrb[26].mxu0 %v815_v19  ;;  %vm752_vm13 = vcmp.gt.f32.partialorder %v642_v17, 0.0 }
 0x1df   :  { %v657_v22 = vadd.f32 %v1455_v21, %v2118_v32  ;;  %v651_v24 = vpop.f32.mrb[31].mxu1  ;;  %v817_v28 = vsel %vm753_vm14, %v647_v15, %v785_v13 }
 0x1e0   :  { %v652_v26 = vadd.f32 %v2118_v32, %v651_v24  ;;  %v816_v27 = vsel %vm752_vm13, %v642_v17, %v784_v20 }
 0x1e1   :  { %v787_v23 = vmul.f32 0.01, %v657_v22  ;;  %1530 = vmatprep.mubr.f32.mxu0 %v816_v27  ;;  %vm755_vm0 = vcmp.gt.f32.partialorder %v657_v22, 0.0 }
 0x1e2   :  { %v786_v25 = vmul.f32 0.01, %v652_v26  ;;  %v1458_v30 = vpop.f32.mrb[32].mxu1  ;;  %1531 = vmatmul.mubr.f32.gmra.mrb[28].mxu0 %v817_v28  ;;  %vm754_vm15 = vcmp.gt.f32.partialorder %v652_v26, 0.0 }
 0x1e3   :  { %v667_v33 = vadd.f32 %v1458_v30, %v2118_v32  ;;  %v661_v34 = vpop.f32.mrb[33].mxu1  ;;  %v819_v39 = vsel %vm755_vm0, %v657_v22, %v787_v23 }
 0x1e4   :  { %v662_v35 = vadd.f32 %v2118_v32, %v661_v34  ;;  %v818_v36 = vsel %vm754_vm15, %v652_v26, %v786_v25 }
 0x1e5   :  { %v789_v38 = vmul.f32 0.01, %v667_v33  ;;  %1533 = vmatprep.mubr.f32.mxu0 %v818_v36  ;;  %vm757_vm2 = vcmp.gt.f32.partialorder %v667_v33, 0.0 }
 0x1e6   :  { %v788_v41 = vmul.f32 0.01, %v662_v35  ;;  %v1461_v42 = vpop.f32.mrb[34].mxu1  ;;  %1534 = vmatmul.mubr.f32.gmra.mrb[30].mxu0 %v819_v39  ;;  %vm756_vm1 = vcmp.gt.f32.partialorder %v662_v35, 0.0 }
 0x1e7   :  { %v677_v31 = vadd.f32 %v1461_v42, %v2118_v32  ;;  %v671_v43 = vpop.f32.mrb[35].mxu1  ;;  %v821_v48 = vsel %vm757_vm2, %v667_v33, %v789_v38 }
 0x1e8   :  { %v672_v44 = vadd.f32 %v2118_v32, %v671_v43  ;;  %v820_v45 = vsel %vm756_vm1, %v662_v35, %v788_v41  ;;  %v2155_v35 = vld [vmem:[%s2239_s6] ss:$0 sm:$0xff]  ;;  %vm1116_vm1 = vcmask 56320  }
 0x1e9   :  { %v791_v46 = vmul.f32 0.01, %v677_v31  ;;  %1536 = vmatprep.mubr.f32.mxu0 %v820_v45  ;;  %vm759_vm4 = vcmp.gt.f32.partialorder %v677_v31, 0.0 }
 0x1ea   :  { %v790_v49 = vmul.f32 0.01, %v672_v44  ;;  %v1464_v51 = vpop.f32.mrb[36].mxu1  ;;  %1537 = vmatmul.mubr.f32.gmra.mrb[32].mxu0 %v821_v48  ;;  %vm758_vm3 = vcmp.gt.f32.partialorder %v672_v44, 0.0 }
 0x1eb   :  { %v687_v52 = vadd.f32 %v1464_v51, %v2118_v32  ;;  %v681_v53 = vpop.f32.mrb[37].mxu1  ;;  %v823_v29 = vsel %vm759_vm4, %v677_v31, %v791_v46 }
 0x1ec   :  { %v682_v40 = vadd.f32 %v2118_v32, %v681_v53  ;;  %v822_v54 = vsel %vm758_vm3, %v672_v44, %v790_v49 }
 0x1ed   :  { %v793_v55 = vmul.f32 0.01, %v687_v52  ;;  %1539 = vmatprep.mubr.f32.mxu0 %v822_v54  ;;  %vm761_vm6 = vcmp.gt.f32.partialorder %v687_v52, 0.0 }
 0x1ee   :  { %v792_v56 = vmul.f32 0.01, %v682_v40  ;;  %v1467_v58 = vpop.f32.mrb[38].mxu1  ;;  %1540 = vmatmul.mubr.f32.gmra.mrb[34].mxu0 %v823_v29  ;;  %vm760_vm5 = vcmp.gt.f32.partialorder %v682_v40, 0.0 }
 0x1ef   :  { %v697_v59 = vadd.f32 %v1467_v58, %v2118_v32  ;;  %v691_v61 = vpop.f32.mrb[39].mxu1  ;;  %v825_v63 = vsel %vm761_vm6, %v687_v52, %v793_v55 }
 0x1f0   :  { %v692_v50 = vadd.f32 %v2118_v32, %v691_v61  ;;  %v824_v37 = vsel %vm760_vm5, %v682_v40, %v792_v56 }
 0x1f1   :  { %v795_v62 = vmul.f32 0.01, %v697_v59  ;;  %1542 = vmatprep.mubr.f32.mxu0 %v824_v37  ;;  %vm763_vm8 = vcmp.gt.f32.partialorder %v697_v59, 0.0 }
 0x1f2   :  { %v794_v0 = vmul.f32 0.01, %v692_v50  ;;  %v1470_v1 = vpop.f32.mrb[40].mxu1  ;;  %1543 = vmatmul.mubr.f32.gmra.mrb[36].mxu0 %v825_v63  ;;  %vm762_vm7 = vcmp.gt.f32.partialorder %v692_v50, 0.0 }
 0x1f3   :  { %v707_v2 = vadd.f32 %v1470_v1, %v2118_v32  ;;  %v701_v47 = vpop.f32.mrb[41].mxu1  ;;  %v827_v7 = vsel %vm763_vm8, %v697_v59, %v795_v62 }
 0x1f4   :  { %v702_v60 = vadd.f32 %v2118_v32, %v701_v47  ;;  %v826_v4 = vsel %vm762_vm7, %v692_v50, %v794_v0 }
 0x1f5   :  { %v797_v5 = vmul.f32 0.01, %v707_v2  ;;  %1545 = vmatprep.mubr.f32.mxu0 %v826_v4  ;;  %vm765_vm10 = vcmp.gt.f32.partialorder %v707_v2, 0.0 }
 0x1f6   :  { %v796_v8 = vmul.f32 0.01, %v702_v60  ;;  %v1473_v57 = vpop.f32.mrb[42].mxu1  ;;  %1546 = vmatmul.mubr.f32.gmra.mrb[38].mxu0 %v827_v7  ;;  %vm764_vm9 = vcmp.gt.f32.partialorder %v702_v60, 0.0 }
 0x1f7   :  { %v717_v6 = vadd.f32 %v1473_v57, %v2118_v32  ;;  %v711_v9 = vpop.f32.mrb[43].mxu1  ;;  %v829_v3 = vsel %vm765_vm10, %v707_v2, %v797_v5 }
 0x1f8   :  { %v712_v10 = vadd.f32 %v2118_v32, %v711_v9  ;;  %v828_v11 = vsel %vm764_vm9, %v702_v60, %v796_v8 }
 0x1f9   :  { %v799_v12 = vmul.f32 0.01, %v717_v6  ;;  %1548 = vmatprep.mubr.f32.mxu0 %v828_v11  ;;  %vm767_vm12 = vcmp.gt.f32.partialorder %v717_v6, 0.0 }
 0x1fa   :  { %v798_v14 = vmul.f32 0.01, %v712_v10  ;;  %v1476_v15 = vpop.f32.mrb[44].mxu1  ;;  %1549 = vmatmul.mubr.f32.gmra.mrb[40].mxu0 %v829_v3  ;;  %vm766_vm11 = vcmp.gt.f32.partialorder %v712_v10, 0.0 }
 0x1fb   :  { %v727_v16 = vadd.f32 %v1476_v15, %v2118_v32  ;;  %v721_v17 = vpop.f32.mrb[45].mxu1  ;;  %v831_v20 = vsel %vm767_vm12, %v717_v6, %v799_v12 }
 0x1fc   :  { %v722_v18 = vadd.f32 %v2118_v32, %v721_v17  ;;  %v830_v13 = vsel %vm766_vm11, %v712_v10, %v798_v14 }
 0x1fd   :  { %v801_v19 = vmul.f32 0.01, %v727_v16  ;;  %1551 = vmatprep.mubr.f32.mxu0 %v830_v13  ;;  %vm769_vm14 = vcmp.gt.f32.partialorder %v727_v16, 0.0 }
 0x1fe   :  { %v800_v21 = vmul.f32 0.01, %v722_v18  ;;  %v1479_v22 = vpop.f32.mrb[46].mxu1  ;;  %1552 = vmatmul.mubr.f32.gmra.mrb[42].mxu0 %v831_v20  ;;  %vm768_vm13 = vcmp.gt.f32.partialorder %v722_v18, 0.0 }
 0x1ff   :  { %v737_v24 = vadd.f32 %v1479_v22, %v2118_v32  ;;  %v731_v26 = vpop.f32.mrb[47].mxu1  ;;  %v833_v25 = vsel %vm769_vm14, %v727_v16, %v801_v19 }
 0x200   :  { %v732_v27 = vadd.f32 %v2118_v32, %v731_v26  ;;  %v832_v23 = vsel %vm768_vm13, %v722_v18, %v800_v21 }
 0x201   :  { %v803_v28 = vmul.f32 0.01, %v737_v24  ;;  %1554 = vmatprep.mubr.f32.mxu0 %v832_v23  ;;  %vm771_vm0 = vcmp.gt.f32.partialorder %v737_v24, 0.0 }
 0x202   :  { %v802_v30 = vmul.f32 0.01, %v732_v27  ;;  %1555 = vmatmul.mubr.f32.gmra.mrb[44].mxu0 %v833_v25  ;;  %vm770_vm15 = vcmp.gt.f32.partialorder %v732_v27, 0.0 }
 0x203   :  { %v835_v34 = vsel %vm771_vm0, %v737_v24, %v803_v28 }
 0x204   :  { %v834_v33 = vsel %vm770_vm15, %v732_v27, %v802_v30 }
 0x205   :  { %1557 = vmatprep.mubr.f32.mxu0 %v834_v33 }
 0x206   :  { %1558 = vmatmul.mubr.f32.gmra.mrb[46].mxu0 %v835_v34 }
 0x29d   :  { %v1514_v36 = vpop.f32.mrb[16].mxu0 }
 0x29e   :  { %v931_v32 = vadd.f32 %v1514_v36, %v2155_v35  ;;  %v925_v38 = vpop.f32.mrb[17].mxu0 }
 0x29f   :  { %v926_v39 = vadd.f32 %v2155_v35, %v925_v38 }
 0x2a0   :  { %1651 = vtanh.f32 %v931_v32 }
 0x2a1   :  { %1653 = vtanh.f32 %v926_v39  ;;  %v1517_v41 = vpop.f32.mrb[18].mxu0 }
 0x2a2   :  { %v941_v42 = vadd.f32 %v1517_v41, %v2155_v35  ;;  %v935_v31 = vpop.f32.mrb[19].mxu0 }
 0x2a3   :  { %v936_v43 = vadd.f32 %v2155_v35, %v935_v31 }
 0x2a4   :  { %1655 = vtanh.f32 %v941_v42 }
 0x2a5   :  { %1657 = vtanh.f32 %v936_v43  ;;  %v1520_v44 = vpop.f32.mrb[20].mxu0 }
 0x2a6   :  { %v951_v45 = vadd.f32 %v1520_v44, %v2155_v35  ;;  %v945_v46 = vpop.f32.mrb[21].mxu0 }
 0x2a7   :  { %v946_v48 = vadd.f32 %v2155_v35, %v945_v46 }
 0x2a8   :  { %1659 = vtanh.f32 %v951_v45 }
 0x2a9   :  { %1661 = vtanh.f32 %v946_v48  ;;  %v1523_v49 = vpop.f32.mrb[22].mxu0 }
 0x2aa   :  { %v1652_v51 = vpop.eup %1651  ;;  %v961_v52 = vadd.f32 %v1523_v49, %v2155_v35  ;;  %v955_v53 = vpop.f32.mrb[23].mxu0 }
 0x2ab   :  { %v1654_v40 = vpop.eup %1653  ;;  %1118 = vst.msk [vmem:[#allocation2 + $0x8] sm:$0xff] %vm1116_vm1, %v1652_v51  ;;  %v956_v54 = vadd.f32 %v2155_v35, %v955_v53 }
 0x2ac   :  { %1117 = vst.msk [vmem:[#allocation2] sm:$0xff] %vm1116_vm1, %v1654_v40  ;;  %1663 = vtanh.f32 %v961_v52 }
 0x2ad   :  { %1665 = vtanh.f32 %v956_v54  ;;  %v1526_v55 = vpop.f32.mrb[24].mxu0 }
 0x2ae   :  { %v1656_v29 = vpop.eup %1655  ;;  %v971_v56 = vadd.f32 %v1526_v55, %v2155_v35  ;;  %v965_v58 = vpop.f32.mrb[25].mxu0 }
 0x2af   :  { %v1658_v59 = vpop.eup %1657  ;;  %1120 = vst.msk [vmem:[#allocation2 + $0x18] sm:$0xff] %vm1116_vm1, %v1656_v29  ;;  %v966_v61 = vadd.f32 %v2155_v35, %v965_v58 }
 0x2b0   :  { %1119 = vst.msk [vmem:[#allocation2 + $0x10] sm:$0xff] %vm1116_vm1, %v1658_v59  ;;  %1667 = vtanh.f32 %v971_v56 }
 0x2b1   :  { %1669 = vtanh.f32 %v966_v61  ;;  %v1529_v50 = vpop.f32.mrb[26].mxu0 }
 0x2b2   :  { %v1660_v37 = vpop.eup %1659  ;;  %v981_v62 = vadd.f32 %v1529_v50, %v2155_v35  ;;  %v975_v63 = vpop.f32.mrb[27].mxu0 }
 0x2b3   :  { %v1662_v0 = vpop.eup %1661  ;;  %1122 = vst.msk [vmem:[#allocation2 + $0x28] sm:$0xff] %vm1116_vm1, %v1660_v37  ;;  %v976_v1 = vadd.f32 %v2155_v35, %v975_v63 }
 0x2b4   :  { %1121 = vst.msk [vmem:[#allocation2 + $0x20] sm:$0xff] %vm1116_vm1, %v1662_v0  ;;  %1671 = vtanh.f32 %v981_v62 }
 0x2b5   :  { %1673 = vtanh.f32 %v976_v1  ;;  %v1532_v2 = vpop.f32.mrb[28].mxu0 }
 0x2b6   :  { %v1664_v47 = vpop.eup %1663  ;;  %v991_v60 = vadd.f32 %v1532_v2, %v2155_v35  ;;  %v985_v4 = vpop.f32.mrb[29].mxu0 }
 0x2b7   :  { %v1666_v5 = vpop.eup %1665  ;;  %1124 = vst.msk [vmem:[#allocation2 + $0x38] sm:$0xff] %vm1116_vm1, %v1664_v47  ;;  %v986_v7 = vadd.f32 %v2155_v35, %v985_v4 }
 0x2b8   :  { %1123 = vst.msk [vmem:[#allocation2 + $0x30] sm:$0xff] %vm1116_vm1, %v1666_v5  ;;  %1675 = vtanh.f32 %v991_v60 }
 0x2b9   :  { %1677 = vtanh.f32 %v986_v7  ;;  %v1535_v8 = vpop.f32.mrb[30].mxu0 }
 0x2ba   :  { %v1668_v57 = vpop.eup %1667  ;;  %v1001_v6 = vadd.f32 %v1535_v8, %v2155_v35  ;;  %v995_v9 = vpop.f32.mrb[31].mxu0 }
 0x2bb   :  { %v1670_v10 = vpop.eup %1669  ;;  %1126 = vst.msk [vmem:[#allocation2 + $0x48] sm:$0xff] %vm1116_vm1, %v1668_v57  ;;  %v996_v11 = vadd.f32 %v2155_v35, %v995_v9 }
 0x2bc   :  { %1125 = vst.msk [vmem:[#allocation2 + $0x40] sm:$0xff] %vm1116_vm1, %v1670_v10  ;;  %1679 = vtanh.f32 %v1001_v6 }
 0x2bd   :  { %1681 = vtanh.f32 %v996_v11  ;;  %v1538_v12 = vpop.f32.mrb[32].mxu0 }
 0x2be   :  { %v1672_v3 = vpop.eup %1671  ;;  %v1011_v14 = vadd.f32 %v1538_v12, %v2155_v35  ;;  %v1005_v15 = vpop.f32.mrb[33].mxu0 }
 0x2bf   :  { %v1674_v16 = vpop.eup %1673  ;;  %1128 = vst.msk [vmem:[#allocation2 + $0x58] sm:$0xff] %vm1116_vm1, %v1672_v3  ;;  %v1006_v17 = vadd.f32 %v2155_v35, %v1005_v15 }
 0x2c0   :  { %1127 = vst.msk [vmem:[#allocation2 + $0x50] sm:$0xff] %vm1116_vm1, %v1674_v16  ;;  %1683 = vtanh.f32 %v1011_v14 }
 0x2c1   :  { %1685 = vtanh.f32 %v1006_v17  ;;  %v1541_v18 = vpop.f32.mrb[34].mxu0 }
 0x2c2   :  { %v1676_v13 = vpop.eup %1675  ;;  %v1021_v19 = vadd.f32 %v1541_v18, %v2155_v35  ;;  %v1015_v20 = vpop.f32.mrb[35].mxu0 }
 0x2c3   :  { %v1678_v21 = vpop.eup %1677  ;;  %1130 = vst.msk [vmem:[#allocation2 + $0x68] sm:$0xff] %vm1116_vm1, %v1676_v13  ;;  %v1016_v22 = vadd.f32 %v2155_v35, %v1015_v20 }
 0x2c4   :  { %1129 = vst.msk [vmem:[#allocation2 + $0x60] sm:$0xff] %vm1116_vm1, %v1678_v21  ;;  %1687 = vtanh.f32 %v1021_v19 }
 0x2c5   :  { %1689 = vtanh.f32 %v1016_v22  ;;  %v1544_v24 = vpop.f32.mrb[36].mxu0 }
 0x2c6   :  { %v1680_v26 = vpop.eup %1679  ;;  %v1031_v27 = vadd.f32 %v1544_v24, %v2155_v35  ;;  %v1025_v23 = vpop.f32.mrb[37].mxu0 }
 0x2c7   :  { %v1682_v28 = vpop.eup %1681  ;;  %1132 = vst.msk [vmem:[#allocation2 + $0x78] sm:$0xff] %vm1116_vm1, %v1680_v26  ;;  %v1026_v25 = vadd.f32 %v2155_v35, %v1025_v23 }
 0x2c8   :  { %1131 = vst.msk [vmem:[#allocation2 + $0x70] sm:$0xff] %vm1116_vm1, %v1682_v28  ;;  %1691 = vtanh.f32 %v1031_v27 }
 0x2c9   :  { %1693 = vtanh.f32 %v1026_v25  ;;  %v1547_v30 = vpop.f32.mrb[38].mxu0 }
 0x2ca   :  { %v1684_v33 = vpop.eup %1683  ;;  %v1041_v34 = vadd.f32 %v1547_v30, %v2155_v35  ;;  %v1035_v36 = vpop.f32.mrb[39].mxu0 }
 0x2cb   :  { %v1686_v32 = vpop.eup %1685  ;;  %1134 = vst.msk [vmem:[#allocation2 + $0x88] sm:$0xff] %vm1116_vm1, %v1684_v33  ;;  %v1036_v38 = vadd.f32 %v2155_v35, %v1035_v36 }
 0x2cc   :  { %1133 = vst.msk [vmem:[#allocation2 + $0x80] sm:$0xff] %vm1116_vm1, %v1686_v32  ;;  %1695 = vtanh.f32 %v1041_v34 }
 0x2cd   :  { %1697 = vtanh.f32 %v1036_v38  ;;  %v1550_v39 = vpop.f32.mrb[40].mxu0 }
 0x2ce   :  { %v1688_v41 = vpop.eup %1687  ;;  %v1051_v42 = vadd.f32 %v1550_v39, %v2155_v35  ;;  %v1045_v31 = vpop.f32.mrb[41].mxu0 }
 0x2cf   :  { %v1690_v43 = vpop.eup %1689  ;;  %1136 = vst.msk [vmem:[#allocation2 + $0x98] sm:$0xff] %vm1116_vm1, %v1688_v41  ;;  %v1046_v44 = vadd.f32 %v2155_v35, %v1045_v31 }
 0x2d0   :  { %1135 = vst.msk [vmem:[#allocation2 + $0x90] sm:$0xff] %vm1116_vm1, %v1690_v43  ;;  %1699 = vtanh.f32 %v1051_v42 }
 0x2d1   :  { %1701 = vtanh.f32 %v1046_v44  ;;  %v1553_v45 = vpop.f32.mrb[42].mxu0 }
 0x2d2   :  { %v1692_v46 = vpop.eup %1691  ;;  %v1061_v48 = vadd.f32 %v1553_v45, %v2155_v35  ;;  %v1055_v49 = vpop.f32.mrb[43].mxu0 }
 0x2d3   :  { %v1694_v51 = vpop.eup %1693  ;;  %1138 = vst.msk [vmem:[#allocation2 + $0xa8] sm:$0xff] %vm1116_vm1, %v1692_v46  ;;  %v1056_v52 = vadd.f32 %v2155_v35, %v1055_v49 }
 0x2d4   :  { %1137 = vst.msk [vmem:[#allocation2 + $0xa0] sm:$0xff] %vm1116_vm1, %v1694_v51  ;;  %1703 = vtanh.f32 %v1061_v48 }
 0x2d5   :  { %1705 = vtanh.f32 %v1056_v52  ;;  %v1556_v53 = vpop.f32.mrb[44].mxu0 }
 0x2d6   :  { %v1696_v40 = vpop.eup %1695  ;;  %v1071_v54 = vadd.f32 %v1556_v53, %v2155_v35  ;;  %v1065_v55 = vpop.f32.mrb[45].mxu0 }
 0x2d7   :  { %v1698_v29 = vpop.eup %1697  ;;  %1140 = vst.msk [vmem:[#allocation2 + $0xb8] sm:$0xff] %vm1116_vm1, %v1696_v40  ;;  %v1066_v56 = vadd.f32 %v2155_v35, %v1065_v55 }
 0x2d8   :  { %1139 = vst.msk [vmem:[#allocation2 + $0xb0] sm:$0xff] %vm1116_vm1, %v1698_v29  ;;  %1707 = vtanh.f32 %v1071_v54 }
 0x2d9   :  { %1709 = vtanh.f32 %v1066_v56  ;;  %v1559_v58 = vpop.f32.mrb[46].mxu0 }
 0x2da   :  { %v1700_v59 = vpop.eup %1699  ;;  %v1081_v61 = vadd.f32 %v1559_v58, %v2155_v35  ;;  %v1075_v50 = vpop.f32.mrb[47].mxu0 }
 0x2db   :  { %v1702_v37 = vpop.eup %1701  ;;  %1142 = vst.msk [vmem:[#allocation2 + $0xc8] sm:$0xff] %vm1116_vm1, %v1700_v59  ;;  %v1076_v62 = vadd.f32 %v2155_v35, %v1075_v50 }
 0x2dc   :  { %1141 = vst.msk [vmem:[#allocation2 + $0xc0] sm:$0xff] %vm1116_vm1, %v1702_v37  ;;  %1711 = vtanh.f32 %v1081_v61 }
 0x2dd   :  { %1713 = vtanh.f32 %v1076_v62 }
 0x2de   :  { %v1704_v63 = vpop.eup %1703 }
 0x2df   :  { %v1706_v0 = vpop.eup %1705  ;;  %1144 = vst.msk [vmem:[#allocation2 + $0xd8] sm:$0xff] %vm1116_vm1, %v1704_v63 }
 0x2e0   :  { %1143 = vst.msk [vmem:[#allocation2 + $0xd0] sm:$0xff] %vm1116_vm1, %v1706_v0 }
 0x2e2   :  { %v1708_v1 = vpop.eup %1707 }
 0x2e3   :  { %v1710_v2 = vpop.eup %1709  ;;  %1146 = vst.msk [vmem:[#allocation2 + $0xe8] sm:$0xff] %vm1116_vm1, %v1708_v1 }
 0x2e4   :  { %1145 = vst.msk [vmem:[#allocation2 + $0xe0] sm:$0xff] %vm1116_vm1, %v1710_v2 }
 0x2e6   :  { %v1712_v47 = vpop.eup %1711 }
 0x2e7   :  { %v1714_v60 = vpop.eup %1713  ;;  %1148 = vst.msk [vmem:[#allocation2 + $0xf8] sm:$0xff] %vm1116_vm1, %v1712_v47 }
 0x2e8   :  { %1147 = vst.msk [vmem:[#allocation2 + $0xf0] sm:$0xff] %vm1116_vm1, %v1714_v60 }
 0x2e9   :  { %1153 = vsyncadd [#allocation3], 3968  ;;  %s1739_s6 = smov [#allocation2]  }
 0x2ea   :  { %s1154_s23 = sshll.u32 %s1739_s6, 4  ;;  %s1155_s23 = int_to_ptr.vmem [resolvable:$true] %s1154_s23 }
 0x2eb   :  { %s1715_s24 = scalar_lea.vmem %s1155_s23, 128  ;;  %s1719_s25 = scalar_lea.vmem %s1155_s23, 4096 }
 0x2ec   :  { %p1716_p0 = scmp.ne.s32.totalorder %s1155_s23, %s1715_s24  ;;  %p1720_p1 = scmp.lt.s32.totalorder %s1155_s23, %s1155_s23 }
 0x2ed   :  { %p1721_p2 = scmp.lt.s32.totalorder %s1719_s25, %s1715_s24 }
 0x2ef   :  { %p1722_p3 = por %p1721_p2, %p1720_p1 }
 0x2f1   :  { %p1723_p4 = pnand %p1722_p3, %p1716_p0 }
 0x2f3   :  { %1726 = shalt.err (!%p1723_p4)
}
 0x2f4   :  { %s1727_s28 = scalar_lea.hbm %s2240_s7, 128 }
 0x2f5   :  { %p1728_p5 = scmp.ne.s32.totalorder %s2240_s7, %s1727_s28  ;;  %p1731_p6 = scmp.lt.u32.totalorder %s1727_s28, %s2240_s7 }
 0x2f7   :  { %p1733_p7 = pnand %p1731_p6, %p1728_p5 }
 0x2f9   :  { %1736 = shalt.err (!%p1733_p7)
}
 0x2fa   :  { %s1740_s10 = smov 128   ;;  %s1741_s11 = smov 8  }
 0x2fb   :  { %1160 = dma.vmem_to_hbm [thread:$0]  %s1155_s23, 128, %s2240_s7, [#allocation3], %s1740_s10, %s1740_s10, %s1741_s11  }
 0x2fc   :  { %1737 = dma.done.wait [#allocation3], 4096  }
 0x2fd   :  { %1738 = vsyncadd [#allocation3], 4294963200 }
 0x2fe   :  { %1164 = vsyncpa [#allocation3], 1 }

</bundles_post_ra>
